<compile_context>
chip_gen: v7x
topology: tpu7x:2x2x1
jax: 0.10.0
libtpu: 0.0.40
codegen_flags: <defaults>
</compile_context>

<pallas_src>
import math

import jax
import jax.numpy as jnp
from jax.experimental import pallas as pl
from jax.experimental.pallas import tpu as pltpu


def _conv_kernel(x_ref, w_ref, o_ref):
    # x_ref: (TB, L, C) f32   -- TB whole batches, full (unpadded) L and C
    # w_ref: (3C, D)   bf16   -- flattened conv taps, resident across the grid
    # o_ref: (TB, L, D)       -- unpadded output block
    tb = x_ref.shape[0]
    w = w_ref[...]                                   # (3C, D) bf16, load once

    def per_batch(b, carry):
        xb = x_ref[b]                                # (L, C) f32
        # Circular taps x[(t-1) mod L], x[t], x[(t+1) mod L].  jnp.roll with a
        # static shift lowers to sublane slices + concat -> stays in VMEM,
        # so x is only ever read once from HBM.
        x_prev = jnp.roll(xb, 1, axis=0)
        x_next = jnp.roll(xb, -1, axis=0)
        xcat = jnp.concatenate([x_prev, xb, x_next], axis=-1)   # (L, 3C)
        acc = jnp.dot(xcat.astype(jnp.bfloat16), w,
                      preferred_element_type=jnp.float32)       # (L, D) f32
        o_ref[b] = acc.astype(o_ref.dtype)
        return carry

    # Short, fixed trip-count loop over the batches in this tile.
    jax.lax.fori_loop(0, tb, per_batch, 0, unroll=True)


def _vmem_budget_and_limit():
    """Generation-aware VMEM sizing (v5e/v6e: 128 MiB, v7x: 64 MiB per core)."""
    try:
        cap = int(pltpu.get_tpu_info().vmem_capacity_bytes)
    except Exception:
        cap = 64 * 1024 * 1024            # conservative fallback (v7x-sized)
    budget = min(int(cap * 0.60), 96 * 1024 * 1024)   # per-step working set
    limit = min(int(cap * 0.75), 104 * 1024 * 1024)   # vmem_limit_bytes
    return budget, limit


def _choose_batch_tile(B, L, C, D, budget_bytes, max_tb=32,
                       target_rows=2048, min_steps=8):
    """Largest TB dividing B such that the grid keeps >= min(B, min_steps)
    steps (pipeline / both v7x TensorCores), rows per step stay near the
    512-2048 sweet spot, and the double-buffered working set fits VMEM."""
    need_steps = min(B, min_steps)
    best = 1
    for tb in range(1, min(B, max_tb) + 1):
        if B % tb:
            continue
        if B // tb < need_steps:
            break                               # steps only shrink as tb grows
        rows = tb * L
        if tb > 1 and rows > target_rows:
            break                               # rows only grow as tb grows
        per_step = (2 * rows * C * 4            # input block, double-buffered f32
                    + 2 * rows * D * 4          # output block, double-buffered f32
                    + 2 * 3 * C * D * 2         # resident bf16 weight (x2 worst case)
                    + L * (6 * 3 * C + 4 * D))  # per-batch in-kernel temporaries
        if per_step > budget_bytes:
            break                               # monotonic in tb
        best = tb
    return best


def token_embedding(x, w_dck, out_dtype=jnp.float32):
    """DCdetector TokenEmbedding forward: circular Conv1d(c_in -> d_model,
    kernel_size=3, padding=1, bias=False) over the length axis.

    x:     (B, L, C) float32
    w_dck: (D, C, 3) float32 (torch Conv1d weight layout)
    returns (B, L, D) `out_dtype` (f32 default; pass bf16 to halve output HBM
    traffic if downstream tolerates it).

    Matmul operands are cast to bf16 in-kernel (accumulation stays f32), i.e.
    ~1e-3 relative error -- acceptable for an embedding layer.
    """
    B, L, C = x.shape
    D, Cw, K = w_dck.shape
    assert K == 3 and Cw == C

    # (D, C, 3) -> (3C, D): row k*C + c holds w[d, c, k], matching the
    # in-kernel tap concat order [x_{t-1}, x_t, x_{t+1}].
    w_flat = jnp.transpose(w_dck, (2, 1, 0)).reshape(3 * C, D).astype(jnp.bfloat16)

    budget, vmem_limit = _vmem_budget_and_limit()
    TB = _choose_batch_tile(B, L, C, D, budget)
    grid = (B // TB,)

    cost = pl.CostEstimate(
        flops=2 * B * L * 3 * C * D,
        transcendentals=0,
        bytes_accessed=(B * L * C * 4 + 3 * C * D * 2
                        + B * L * D * jnp.dtype(out_dtype).itemsize),
    )

    return pl.pallas_call(
        _conv_kernel,
        out_shape=jax.ShapeDtypeStruct((B, L, D), out_dtype),
        grid_spec=pltpu.PrefetchScalarGridSpec(
            num_scalar_prefetch=0,
            grid=grid,
            in_specs=[
                # Full (unpadded) L and C extents; Mosaic pads to (8,128)
                # tiles inside VMEM for free -- no extra HBM bytes.
                pl.BlockSpec((TB, L, C), lambda i: (i, 0, 0)),
                # Weight is resident: constant index map -> fetched once.
                pl.BlockSpec((3 * C, D), lambda i: (0, 0)),
            ],
            out_specs=pl.BlockSpec((TB, L, D), lambda i: (i, 0, 0)),
        ),
        compiler_params=pltpu.CompilerParams(
            dimension_semantics=("parallel",),
            vmem_limit_bytes=vmem_limit,
        ),
        cost_estimate=cost,
    )(x.astype(jnp.float32), w_flat)


def init_conv_weight(key, c_in, d_model, kernel_size=3):
    """Kaiming-normal (fan_in, leaky_relu slope=0.01), matching nn.init.kaiming_normal_."""
    fan_in = c_in * kernel_size
    gain = math.sqrt(2.0 / (1.0 + 0.01 ** 2))
    std = gain / math.sqrt(fan_in)
    # torch Conv1d weight layout: (d_model, c_in, kernel_size)
    return jax.random.normal(key, (d_model, c_in, kernel_size), dtype=jnp.float32) * std


def reference_token_embedding(x, w_dck):
    """Pure-JAX f32 reference of circular Conv1d(k=3, pad=1, no bias)."""
    out = jnp.zeros(x.shape[:2] + (w_dck.shape[0],), jnp.float32)
    for k in range(3):
        xs = jnp.roll(x, shift=1 - k, axis=1)          # x[b, (t+k-1) mod L, c]
        out = out + jnp.einsum("blc,dc->bld", xs, w_dck[:, :, k])
    return out


if __name__ == "__main__":
    B, L, C_IN, D_MODEL = 2, 8, 4, 32

    key = jax.random.PRNGKey(0)
    kx, kw = jax.random.split(key)

    x = jax.random.normal(kx, (B, L, C_IN), dtype=jnp.float32)
    w_dck = init_conv_weight(kw, C_IN, D_MODEL, kernel_size=3)   # (D, C, 3)

    out = jax.block_until_ready(token_embedding(x, w_dck))

    ref = reference_token_embedding(x, w_dck)
    assert out.shape == (B, L, D_MODEL)
    assert out.dtype == jnp.float32
    # bf16 MXU operands (f32 accumulation) vs f32 reference -> relaxed tolerance.
    max_err = float(jnp.max(jnp.abs(out - ref)))
    assert jnp.allclose(out, ref, atol=5e-2, rtol=5e-2), (
        f"mismatch vs reference (max abs err {max_err})")

    print("KERNEL_OK")
</pallas_src>

<mosaic_0001>
module attributes {stable_mosaic.version = 11 : i64} {
  func.func @_conv_kernel(%arg0: i32, %arg1: memref<1x8x4xf32, #tpu.memory_space<vmem>>, %arg2: memref<12x32xbf16, #tpu.memory_space<vmem>>, %arg3: memref<1x8x32xf32, #tpu.memory_space<vmem>>) attributes {dimension_semantics = [#tpu.dimension_semantics<parallel>], iteration_bounds = array<i64: 2>, scalar_prefetch = 0 : i64, scratch_operands = 0 : i64, tpu.core_type = #tpu.core_type<tc>, window_params = [{transform_indices = @transform_0, window_bounds = array<i64: 1, 8, 4>}, {pipeline_mode = #tpu.pipeline_mode<synchronous>, transform_indices = @transform_1, window_bounds = array<i64: 12, 32>}, {transform_indices = @transform_2, window_bounds = array<i64: 1, 8, 32>}]} {
    %c0 = arith.constant 0 : index
    %c0_0 = arith.constant 0 : index
    %0 = vector.load %arg2[%c0, %c0_0] : memref<12x32xbf16, #tpu.memory_space<vmem>>, vector<12x32xbf16>
    %c0_i32 = arith.constant 0 : i32
    %1 = arith.index_cast %c0_i32 : i32 to index
    %c0_1 = arith.constant 0 : index
    %c0_2 = arith.constant 0 : index
    %2 = vector.load %arg1[%1, %c0_1, %c0_2] : memref<1x8x4xf32, #tpu.memory_space<vmem>>, vector<1x8x4xf32>
    %3 = vector.shape_cast %2 : vector<1x8x4xf32> to vector<8x4xf32>
    %4 = vector.extract_strided_slice %3 {offsets = [7, 0], sizes = [1, 4], strides = [1, 1]} : vector<8x4xf32> to vector<1x4xf32>
    %5 = vector.extract_strided_slice %3 {offsets = [0, 0], sizes = [7, 4], strides = [1, 1]} : vector<8x4xf32> to vector<7x4xf32>
    %6 = tpu.concatenate %4, %5 in 0 : vector<1x4xf32>, vector<7x4xf32> -> vector<8x4xf32>
    %7 = vector.extract_strided_slice %3 {offsets = [1, 0], sizes = [7, 4], strides = [1, 1]} : vector<8x4xf32> to vector<7x4xf32>
    %8 = vector.extract_strided_slice %3 {offsets = [0, 0], sizes = [1, 4], strides = [1, 1]} : vector<8x4xf32> to vector<1x4xf32>
    %9 = tpu.concatenate %7, %8 in 0 : vector<7x4xf32>, vector<1x4xf32> -> vector<8x4xf32>
    %10 = tpu.concatenate %6, %3, %9 in 1 : vector<8x4xf32>, vector<8x4xf32>, vector<8x4xf32> -> vector<8x12xf32>
    %11 = arith.truncf %10 : vector<8x12xf32> to vector<8x12xbf16>
    %cst = arith.constant dense<0.000000e+00> : vector<8x32xf32>
    %12 = tpu.matmul %11, %0, %cst {dimension_numbers = #tpu.dot_dimension_numbers<[1], [0], [0], [1], [0, 0, 1, 1], [], []>} : vector<8x12xbf16>, vector<12x32xbf16>, vector<8x32xf32> -> vector<8x32xf32>
    %13 = arith.index_cast %c0_i32 : i32 to index
    %c0_3 = arith.constant 0 : index
    %c0_4 = arith.constant 0 : index
    %14 = vector.load %arg3[%13, %c0_3, %c0_4] : memref<1x8x32xf32, #tpu.memory_space<vmem>>, vector<1x8x32xf32>
    %15 = vector.shape_cast %14 : vector<1x8x32xf32> to vector<8x32xf32>
    %16 = vector.shape_cast %12 : vector<8x32xf32> to vector<1x8x32xf32>
    tpu.vector_store %arg3[%13, %c0_3, %c0_4], %16 {strides = array<i32>} : memref<1x8x32xf32, #tpu.memory_space<vmem>>, vector<1x8x32xf32>,
    %c1_i32 = arith.constant 1 : i32
    return
  }
  func.func @transform_0(%arg0: i32) -> (i32, i32, i32) {
    %c0_i32 = arith.constant 0 : i32
    %c0_i32_0 = arith.constant 0 : i32
    %c0_i32_1 = arith.constant 0 : i32
    return %arg0, %c0_i32, %c0_i32_0 : i32, i32, i32
  }
  func.func @transform_1(%arg0: i32) -> (i32, i32) {
    %c0_i32 = arith.constant 0 : i32
    %c0_i32_0 = arith.constant 0 : i32
    %c0_i32_1 = arith.constant 0 : i32
    return %c0_i32, %c0_i32_0 : i32, i32
  }
  func.func @transform_2(%arg0: i32) -> (i32, i32, i32) {
    %c0_i32 = arith.constant 0 : i32
    %c0_i32_0 = arith.constant 0 : i32
    %c0_i32_1 = arith.constant 0 : i32
    return %arg0, %c0_i32, %c0_i32_0 : i32, i32, i32
  }
}

</mosaic_0001>

<bundles_post_ra>
// kernel: tpu_custom_call.1
= control target key start
LH: loop header
LB: loop body
LE: loop exit
PB: predicated region body
PF: predicated region fallthrough
CT: control target
= control target key end

     0   :  { %7 = vsyncpa [#allocation3], 0  ;;  %s543_s0 = inlined_call_operand.vmem [shape: f32[2,8,4], index: 0, kind: input, shape index: {}]   ;;  %s544_s1 = inlined_call_operand.vmem [shape: bf16[12,32], index: 1, kind: input, shape index: {}]   ;;  %s545_s2 = inlined_call_operand.hbm [shape: f32[2,8,32], index: 2, kind: output, shape index: {}]  }
   0x1   :  { %9 = vsyncpa [#allocation3 + $0x1], 0  ;;  %s440_s9 = smov 0   ;;  %s442_s10 = smov 0  }
   0x2   :  { %s444_s11 = smov 0   ;;  %s446_s12 = smov 0  }
   0x3 LB: > { %s461_s13 = sadd.s32 4294967295, %s418_s12   ;;  %s292_s14 = sadd.s32 4294967294, %s418_s12   ;;  %s418_s12 = sphi %s446_s12, %s551_s12   ;;  %s414_s11 = sphi %s444_s11, %s550_s11   ;;  %s410_s10 = sphi %s442_s10, %s549_s10   ;;  %s406_s9 = sphi %s440_s9, %s548_s9  }
   0x4   : > { %s465_s15 = sadd.s32 1, %s418_s12   ;;  %s69_s16 = sadd.s32 1, %s414_s11 }
   0x5   : > { %s66_s17 = ssub.s32 %s418_s12, %s465_s15  ;;  %p79_p0 = scmp.ne.s32.totalorder %s414_s11, %s410_s10 }
   0x6   : > { %p67_p1 = scmp.eq.s32.totalorder %s66_s17, 0  ;;  %p80_p2 = scmp.eq.s32.totalorder %s461_s13, 1 }
   0x7   : > { %p85_p3 = scmp.ne.s32.totalorder %s410_s10, %s406_s9  ;;  %p86_p4 = scmp.eq.s32.totalorder %s292_s14, 1 }
   0x8   : > { %s476_s18 = scalar_select %p67_p1, %s414_s11, %s69_s16  }
   0x9   : > { %p478_p5 = por %p80_p2, %p79_p0  ;;  %p482_p6 = por %p86_p4, %p85_p3 }
   0xa   : > { %p295_p7 = scmp.ge.s32.totalorder %s418_s12, 1  ;;  %p114_p8 = scmp.lt.s32.totalorder %s418_s12, 3 }
   0xc   : > { %p115_p9 = pnand %p295_p7, %p114_p8 }
   0xd   : > { %p135_p10 = scmp.lt.s32.totalorder (!%p115_p9), %s461_s13, 1  ;;  %v420_v0 = vmov (!%p115_p9), 0.0   ;;  %vm173_vm0 = vcmask (!%p115_p9), 1045504   ;;  %v355_v1 = vld [vmem:[%s544_s1] sm:$0x3f] (!%p115_p9)   ;;  %vm421_vm1 = vmmov (!%p115_p9), 0  }
   0xe   : > { %118 = sbr.rel (%p115_p9) target bundleno = 375 (0x177), region = 28  ;;  %306 = vmatprep.subr.bf16.mxu0 (!%p115_p9), %v420_v0  ;;  %308 = vmatprep.mubr.msk.bf16.mxu0 (!%p115_p9), %vm421_vm1, %v420_v0  ;;  %v175_v2 = vsel (!%p115_p9), %vm173_vm0, %v355_v1, 0  ;;  %s422_s28 = smov (!%p115_p9), 4   ;;  %vm159_vm2 = vcmask (!%p115_p9), 31744   ;;  %vm161_vm3 = vcmask (!%p115_p9), 64512   ;;  %vm169_vm4 = vcmask (!%p115_p9), 97280  }
   0xf   : > { %307 = vmatpush3.bf16.msra.mxu0 (!%p115_p9), %v175_v2  ;;  %s423_s29 = smov (!%p115_p9), 8   ;;  %s132_s30 = sand.u32 (!%p115_p9), 1, %s410_s10   ;;  %vm217_vm5 = vcmask (!%p115_p9), 261120  }
  0x10   : > { %s296_s3 = sshll.u32 (!%p115_p9), %s132_s30, 3  ;;  %s301_s4 = sshll.u32 (!%p115_p9), %s461_s13, 7 }
  0x11   : > { %s134_s5 = scalar_lea.vmem (!%p115_p9), [#allocation2], %s296_s3  ;;  %s501_s14 = scalar_lea.hbm (!%p115_p9), %s545_s2, %s301_s4 }
  0x12   : > { %s233_s6 = sshll.u32 (!%p115_p9), %s134_s5, 4  ;;  %s220_s16 = scalar_lea.sflag (!%p115_p9), [#allocation3], %s132_s30  ;;  %s503_s6 = int_to_ptr.vmem [resolvable:$true] %s233_s6 }
  0x13   : > { %s356_s17 = scalar_lea.vmem (!%p115_p9), %s503_s6, 128 }
  0x14   : > { %p357_p11 = scmp.ne.s32.totalorder (!%p115_p9), %s503_s6, %s356_s17 }
  0x15   : > { %s136_s21 = scalar_select %p135_p10, %s461_s13, 1 }
  0x16   : > { %p358_p12 = pnand %p357_p11, %p478_p5  ;;  %s424_s13 = smov [#allocation2]  }
  0x17   : > { %s297_s24 = sshll.u32 %s136_s21, 3  ;;  %s360_s21 = sshll.u32 %s424_s13, 4  ;;  %s361_s21 = int_to_ptr.vmem [resolvable:$false] %s360_s21 }
  0x18   : > { %s138_s27 = scalar_lea.vmem %s543_s0, %s297_s24  ;;  %p359_p13 = pneg %p358_p12 }
  0x19   : > { %v142_v3 = vld [vmem:[%s138_s27] sm:$0xff]  ;;  %s362_s22 = scalar_lea.vmem %s361_s21, 256  ;;  %p363_p0 = scmp.lt.s32.totalorder %s503_s6, %s361_s21 }
  0x1a   : > { %152 = vrot.lane.b32.xlu0 %v142_v3, %s422_s28  ;;  %v148_v4 = vrot.slane %v142_v3, 1  ;;  %v144_v5 = vrot.slane %v142_v3, 7  ;;  %p364_p1 = scmp.lt.s32.totalorder %s362_s22, %s356_s17 }
  0x1c   : > { %p365_p2 = por %p364_p1, %p363_p0 }
  0x1e   : > { %156 = vrot.lane.b32.xlu0 %v148_v4, %s423_s29  ;;  %p366_p3 = pnand %p365_p2, %p359_p13 }
  0x8c   : > { %v153_v6 = vpop.permute.xlu0 %152 }
  0x8d   : > { %v160_v7 = vsel %vm159_vm2, %v144_v5, %v153_v6 }
  0x90   : > { %v157_v8 = vpop.permute.xlu0 %156 }
  0x91   : > { %v162_v9 = vsel %vm161_vm3, %v160_v7, %v157_v8 }
  0x92   : > { %v163_v10 = vpack.c.bf16 %v162_v9, %v162_v9 }
  0x94   : > { %309 = vmatmul.mubr.msk.bf16.vlgmr.msra.gmra.mrb[0].mxu0 %vm169_vm4, %v163_v10 }
 0x167   : > { %v211_v11 = vpop.f32.mrb[0].mxu0 }
 0x168   : > { %218 = vst.msk [vmem:[%s134_s5] sm:$0xff] %vm217_vm5, %v211_v11  ;;  %v310_v12 = vpop.f32.mrb[1].mxu0 }
 0x169   : > { %v214_v13 = vpop.f32.mrb[2].mxu0 }
 0x16a   : > { %369 = shalt.err (!%p366_p3)
}
 0x16b   : > { %s370_s23 = scalar_lea.hbm %s501_s14, 128  ;;  %s374_s26 = scalar_lea.hbm %s545_s2, 256 }
 0x16c   : > { %p371_p4 = scmp.ne.s32.totalorder %s501_s14, %s370_s23  ;;  %p375_p9 = scmp.lt.u32.totalorder %s501_s14, %s545_s2 }
 0x16d   : > { %p376_p10 = scmp.lt.u32.totalorder %s374_s26, %s370_s23  ;;  %p378_p12 = scmp.lt.u32.totalorder %s370_s23, %s501_s14 }
 0x16e   : > { %p372_p7 = pnand %p371_p4, %p478_p5 }
 0x16f   : > { %p377_p11 = por %p376_p10, %p375_p9 }
 0x170   : > { %p373_p8 = pneg %p372_p7 }
 0x171   : > { %p379_p13 = por %p378_p12, %p377_p11 }
 0x173   : > { %p380_p0 = pnand %p379_p13, %p373_p8 }
 0x175   : > { %383 = shalt.err (!%p380_p0)
}
 0x176   : > { %312 = dma.vmem_to_hbm [thread:$0]  (%p478_p5), %s503_s6, 128, %s501_s14, %s220_s16   ;;  %v311_v14 = vpop.f32.mrb[3].mxu0 }
 0x177 PF: > { %p318_p1 = scmp.ge.s32.totalorder %s418_s12, 2  ;;  %s245_s29 = sand.u32 1, %s406_s9  }
 0x178   : > { %s246_s30 = scalar_lea.sflag [#allocation3], %s245_s29 }
 0x179   : > { %p315_p2 = pnand %p318_p1, %p482_p6 }
 0x17b   : > { %401 = dma.done.wait (!%p315_p2), %s246_s30, 128  }
 0x17c   : > { %403 = vsyncadd (!%p315_p2), %s246_s30, 4294967168  ;;  %p12_p3 = scmp.ge.s32.totalorder %s465_s15, 4   ;;  %s548_s9 = smov %s410_s10 }
 0x17d   : > { %s549_s10 = smov %s414_s11  ;;  %s550_s11 = smov %s476_s18 }
 0x17e   : > { %s551_s12 = smov %s465_s15  ;;  %14 = sbr.rel (!%p12_p3) target bundleno = 3 (0x3), region = 63 }
 0x185   :  { %251 = vsyncpa [#allocation3], 1 }
 0x186   :  { %253 = vsyncpa [#allocation3 + $0x1], 1 }

</bundles_post_ra>
